<compile_context>
chip_gen: v5e
topology: v5e:2x2
jax: 0.10.0
libtpu: 0.0.40
codegen_flags: <defaults>
</compile_context>

<pallas_src>
import functools

import jax
import jax.numpy as jnp
from jax.experimental import pallas as pl
from jax.experimental.pallas import tpu as pltpu


def projection_kernel(x_ref, w1_ref, gamma_ref, beta_ref, w2_ref, out_ref):
    """Grid = (cores, H tiles); one step processes one tile_h slab of H.

    x_ref:     [B, D_in]   resident (constant index map)
    w1_ref:    [D_in, tH]  streamed
    gamma_ref: [1, tH]     f32
    beta_ref:  [1, tH]     f32
    w2_ref:    [tH, O]     streamed
    out_ref:   [B, O]      f32 per-core partial, accumulated in place
                           (resident across the inner "arbitrary" axis)
    """
    j = pl.program_id(1)

    @pl.when(j == 0)
    def _init():
        out_ref[...] = jnp.zeros_like(out_ref)

    # ---- Linear 1 on this H slab (bias omitted: cancelled by BN mean sub) ----
    h = jnp.dot(x_ref[...], w1_ref[...], preferred_element_type=jnp.float32)  # [B, tH]

    # ---- BatchNorm1d (training mode, batch stats) folded into scale/shift ----
    # NOTE: E[h^2]-E[h]^2 can lose precision if |mean| >> std; clamped at 0 and
    # validated against the f32 reference below.
    inv_b = 1.0 / h.shape[0]
    mean = jnp.sum(h, axis=0, keepdims=True) * inv_b          # [1, tH]
    mean_sq = jnp.sum(h * h, axis=0, keepdims=True) * inv_b   # same sweep as mean
    var = jnp.maximum(mean_sq - mean * mean, 0.0)
    scale = gamma_ref[...] * jax.lax.rsqrt(var + 1e-5)        # [1, tH]
    shift = beta_ref[...] - mean * scale                      # [1, tH]

    # ---- BN affine + ReLU (single FMA pass over the B x tH tile) ----
    h = jnp.maximum(h * scale + shift, 0.0)

    # ---- Linear 2 (no bias): accumulate directly into the resident output ----
    out_ref[...] += jnp.dot(h.astype(w2_ref.dtype), w2_ref[...],
                            preferred_element_type=jnp.float32)


def _tpu_generation():
    try:
        kind = jax.devices()[0].device_kind.lower()
    except Exception:
        return 0
    if "v7" in kind or "7x" in kind:
        return 7
    if "v6" in kind:
        return 6
    if "v5" in kind:
        return 5
    return 0


def _pick_tile_h(h_pad, batch, gen):
    if gen == 7:
        max_tile = 256 if batch >= 2048 else 512   # v7x: 64 MiB physical VMEM
    elif gen == 6:
        max_tile = 1024                            # v6e: 128 MiB -> fewer grid steps
    elif gen == 5 and batch <= 512:
        max_tile = 256                             # v5e small-B: weight-streaming bound
    else:
        max_tile = 512
    for t in (1024, 512, 256, 128):
        if t <= max_tile and h_pad % t == 0:
            return t
    return 128  # h_pad is always a multiple of 128


def _x_block_spec(shape, index_map, single_buffer):
    """Constant-index resident block: request a single buffer (no re-fetch ever
    happens), falling back to a plain BlockSpec if unsupported."""
    if single_buffer and hasattr(pl, "Buffered"):
        try:
            return pl.BlockSpec(shape, index_map, pipeline_mode=pl.Buffered(1))
        except Exception:
            pass
    return pl.BlockSpec(shape, index_map)


@functools.partial(jax.jit, static_argnames=("tile_h", "num_cores", "use_bf16",
                                             "single_buffer_x", "vmem_limit_bytes"))
def projection_forward(x, w1_t, b1, gamma, beta, w2_t, *, tile_h=None, num_cores=2,
                       use_bf16=True, single_buffer_x=True, vmem_limit_bytes=None):
    """Forward pass of `Projection`.

    x:     [B, D_in]  float32
    w1_t:  [D_in, H]  Linear-1 weight (pre-transposed)
    b1:    [H]        ignored: cancelled exactly by training-mode BatchNorm
    gamma: [H]        BN weight
    beta:  [H]        BN bias
    w2_t:  [H, O]     Linear-2 weight (pre-transposed, no bias)
    """
    del b1  # bias before training-mode BatchNorm is cancelled by mean subtraction

    B, D_in = x.shape
    H = w1_t.shape[1]
    O = w2_t.shape[1]
    gen = _tpu_generation()

    # Pad H to a multiple of 128 (zero pad is exact; see header comment).
    H_pad = ((H + 127) // 128) * 128
    if H_pad != H:
        p = H_pad - H
        w1_t = jnp.pad(w1_t, ((0, 0), (0, p)))
        w2_t = jnp.pad(w2_t, ((0, p), (0, 0)))
        gamma = jnp.pad(gamma.reshape(-1), (0, p))
        beta = jnp.pad(beta.reshape(-1), (0, p))

    if tile_h is None:
        tile_h = _pick_tile_h(H_pad, B, gen)
    assert H_pad % tile_h == 0
    n_h_total = H_pad // tile_h

    # Leading "parallel" core axis (v7x megacore).  Harmless (sequential) on
    # single-TC chips; each core produces a partial [B, O].
    n_cores = num_cores if (num_cores > 1 and n_h_total % num_cores == 0) else 1
    n_h = n_h_total // n_cores

    gamma = gamma.reshape(1, H_pad).astype(jnp.float32)
    beta = beta.reshape(1, H_pad).astype(jnp.float32)

    # bf16 on the MXU path halves weight DMA/VMEM bytes; BN math stays f32.
    mm_dtype = jnp.bfloat16 if use_bf16 else jnp.float32
    x_in = x.astype(mm_dtype)
    w1_in = w1_t.astype(mm_dtype)
    w2_in = w2_t.astype(mm_dtype)
    itemsize = jnp.dtype(mm_dtype).itemsize

    if vmem_limit_bytes is None:
        x_bufs = 1 if (single_buffer_x and hasattr(pl, "Buffered")) else 2
        est = (x_bufs * B * D_in * itemsize        # resident x
               + 2 * D_in * tile_h * itemsize      # w1 slab (double-buffered)
               + 2 * tile_h * O * itemsize         # w2 slab (double-buffered)
               + 2 * 2 * tile_h * 4                # gamma / beta tiles
               + 2 * B * O * 4                     # resident f32 output block
               + 3 * B * tile_h * 4)               # f32 h, h*h, bf16-cast temporaries
        cap = 56 * 1024 * 1024 if gen == 7 else 100 * 1024 * 1024
        vmem_limit_bytes = max(16 * 1024 * 1024, min(int(est * 3 // 2), cap))

    cost = pl.CostEstimate(
        flops=2 * B * (D_in * H_pad + H_pad * O),
        transcendentals=H_pad,  # one rsqrt per BN feature across all tiles
        bytes_accessed=(x_in.size + w1_in.size + w2_in.size) * itemsize
        + (gamma.size + beta.size) * 4 + n_cores * B * O * 4,
    )

    partials = pl.pallas_call(
        projection_kernel,
        out_shape=jax.ShapeDtypeStruct((n_cores, B, O), jnp.float32),
        grid=(n_cores, n_h),
        in_specs=[
            _x_block_spec((B, D_in), lambda c, j: (0, 0), single_buffer_x),  # x resident
            pl.BlockSpec((D_in, tile_h), lambda c, j: (0, c * n_h + j)),     # w1 tile
            pl.BlockSpec((1, tile_h), lambda c, j: (0, c * n_h + j)),        # gamma tile
            pl.BlockSpec((1, tile_h), lambda c, j: (0, c * n_h + j)),        # beta tile
            pl.BlockSpec((tile_h, O), lambda c, j: (c * n_h + j, 0)),        # w2 tile
        ],
        out_specs=pl.BlockSpec((None, B, O), lambda c, j: (c, 0, 0)),        # per-core partial
        compiler_params=pltpu.CompilerParams(
            dimension_semantics=("parallel", "arbitrary"),
            vmem_limit_bytes=vmem_limit_bytes,
        ),
        cost_estimate=cost,
    )(x_in, w1_in, gamma, beta, w2_in)

    # Combine per-core partials, then F.normalize(z, dim=1) (eps=1e-12 on the
    # norm <=> clamp squared norm at 1e-24).  Tiny [B, O] epilogue in XLA.
    z = jnp.sum(partials, axis=0)
    sumsq = jnp.sum(z * z, axis=1, keepdims=True)
    return z * jax.lax.rsqrt(jnp.maximum(sumsq, 1e-24))


def reference_forward(x, w1_t, b1, gamma, beta, w2_t):
    """Pure-JAX f32 reference with the original (bias-included) formulation."""
    h = x @ w1_t + b1.reshape(1, -1)
    mean = jnp.mean(h, axis=0, keepdims=True)
    var = jnp.mean((h - mean) ** 2, axis=0, keepdims=True)
    h = (h - mean) / jnp.sqrt(var + 1e-5) * gamma.reshape(1, -1) + beta.reshape(1, -1)
    h = jnp.maximum(h, 0.0)
    z = h @ w2_t
    norm = jnp.linalg.norm(z, axis=1, keepdims=True)
    return z / jnp.maximum(norm, 1e-12)


if __name__ == "__main__":
    # Small shapes consistent with the module (defaults 2048/2048/128, scaled
    # down).  HID=448 is deliberately NOT a multiple of 128 to exercise the
    # zero-padding path; tile_h=128 with num_cores=2 exercises the per-core
    # partial + in-place output accumulation (2 cores x 2 H tiles each).
    B, D_IN, HID, D_OUT = 16, 64, 448, 32

    key = jax.random.PRNGKey(0)
    kx, kw1, kb1, kw2 = jax.random.split(key, 4)

    x = jax.random.normal(kx, (B, D_IN), dtype=jnp.float32)
    # PyTorch-Linear-style uniform init bounds (deterministic).
    bound1 = 1.0 / (D_IN ** 0.5)
    w1_t = jax.random.uniform(kw1, (D_IN, HID), jnp.float32, -bound1, bound1)
    b1 = jax.random.uniform(kb1, (HID,), jnp.float32, -bound1, bound1)
    bound2 = 1.0 / (HID ** 0.5)
    w2_t = jax.random.uniform(kw2, (HID, D_OUT), jnp.float32, -bound2, bound2)
    # BatchNorm1d affine params at default init (gamma=1, beta=0).
    gamma = jnp.ones((HID,), jnp.float32)
    beta = jnp.zeros((HID,), jnp.float32)

    ref = reference_forward(x, w1_t, b1, gamma, beta, w2_t)

    def run(**kw):
        try:
            return jax.block_until_ready(
                projection_forward(x, w1_t, b1, gamma, beta, w2_t, **kw))
        except Exception:
            # Fall back if single-buffered pipeline_mode is rejected on this build.
            kw = dict(kw, single_buffer_x=False)
            return jax.block_until_ready(
                projection_forward(x, w1_t, b1, gamma, beta, w2_t, **kw))

    # --- f32 matmul path: exact-semantics check (bias drop, H padding, 2-core) ---
    out_f32 = run(tile_h=128, num_cores=2, use_bf16=False)
    assert out_f32.shape == (B, D_OUT)
    assert jnp.allclose(out_f32, ref, atol=1e-4, rtol=1e-4), "f32 mismatch vs reference"
    assert jnp.allclose(jnp.linalg.norm(out_f32, axis=1), 1.0, atol=1e-5)

    # --- single-core path sanity (no megacore split) ---
    out_c1 = run(tile_h=128, num_cores=1, use_bf16=False)
    assert jnp.allclose(out_c1, ref, atol=1e-4, rtol=1e-4), "single-core mismatch"

    # --- bf16 matmul path, auto tile / default cores (perf config): looser tol ---
    out_bf16 = run()
    assert out_bf16.shape == (B, D_OUT)
    assert jnp.allclose(out_bf16, ref, atol=3e-2, rtol=3e-2), "bf16 mismatch vs reference"
    assert jnp.allclose(jnp.linalg.norm(out_bf16, axis=1), 1.0, atol=1e-4)

    print("KERNEL_OK")
</pallas_src>

<mosaic_0001>
module attributes {stable_mosaic.version = 11 : i64} {
  func.func @projection_kernel(%arg0: i32, %arg1: i32, %arg2: memref<16x64xf32, #tpu.memory_space<vmem>>, %arg3: memref<64x128xf32, #tpu.memory_space<vmem>>, %arg4: memref<1x128xf32, #tpu.memory_space<vmem>>, %arg5: memref<1x128xf32, #tpu.memory_space<vmem>>, %arg6: memref<128x32xf32, #tpu.memory_space<vmem>>, %arg7: memref<1x16x32xf32, #tpu.memory_space<vmem>>) attributes {dimension_semantics = [#tpu.dimension_semantics<parallel>, #tpu.dimension_semantics<arbitrary>], iteration_bounds = array<i64: 2, 2>, scalar_prefetch = 0 : i64, scratch_operands = 0 : i64, tpu.core_type = #tpu.core_type<tc>, window_params = [{pipeline_mode = #tpu.pipeline_mode<synchronous>, transform_indices = @transform_0, window_bounds = array<i64: 16, 64>}, {transform_indices = @transform_1, window_bounds = array<i64: 64, 128>}, {transform_indices = @transform_2, window_bounds = array<i64: 1, 128>}, {transform_indices = @transform_3, window_bounds = array<i64: 1, 128>}, {transform_indices = @transform_4, window_bounds = array<i64: 128, 32>}, {transform_indices = @transform_5, window_bounds = array<i64: 1, 16, 32>}]} {
    %c0_i32 = arith.constant 0 : i32
    %0 = arith.cmpi eq, %arg1, %c0_i32 : i32
    %1 = arith.extui %0 : i1 to i32
    %c0_i32_0 = arith.constant 0 : i32
    %2 = arith.cmpi ne, %1, %c0_i32_0 : i32
    scf.if %2 {
      %cst_24 = arith.constant 0.000000e+00 : f32
      %41 = vector.broadcast %cst_24 : f32 to vector<16x32xf32>
      %c0_25 = arith.constant 0 : index
      %c0_26 = arith.constant 0 : index
      %c0_27 = arith.constant 0 : index
      %42 = vector.load %arg7[%c0_25, %c0_26, %c0_27] : memref<1x16x32xf32, #tpu.memory_space<vmem>>, vector<1x16x32xf32>
      %43 = vector.shape_cast %42 : vector<1x16x32xf32> to vector<16x32xf32>
      %44 = vector.shape_cast %41 : vector<16x32xf32> to vector<1x16x32xf32>
      tpu.vector_store %arg7[%c0_25, %c0_26, %c0_27], %44 {strides = array<i32>} : memref<1x16x32xf32, #tpu.memory_space<vmem>>, vector<1x16x32xf32>,
    } else {
    }
    %c0 = arith.constant 0 : index
    %c0_1 = arith.constant 0 : index
    %3 = vector.load %arg2[%c0, %c0_1] : memref<16x64xf32, #tpu.memory_space<vmem>>, vector<16x64xf32>
    %c0_2 = arith.constant 0 : index
    %c0_3 = arith.constant 0 : index
    %4 = vector.load %arg3[%c0_2, %c0_3] : memref<64x128xf32, #tpu.memory_space<vmem>>, vector<64x128xf32>
    %cst = arith.constant dense<0.000000e+00> : vector<16x128xf32>
    %5 = tpu.matmul %3, %4, %cst {dimension_numbers = #tpu.dot_dimension_numbers<[1], [0], [0], [1], [0, 0, 1, 1], [], []>} : vector<16x64xf32>, vector<64x128xf32>, vector<16x128xf32> -> vector<16x128xf32>
    %cst_4 = arith.constant dense<0.000000e+00> : vector<128xf32>
    %6 = vector.multi_reduction <add>, %5, %cst_4 [0] : vector<16x128xf32> to vector<128xf32>
    %7 = vector.shape_cast %6 : vector<128xf32> to vector<1x128xf32>
    %cst_5 = arith.constant 6.250000e-02 : f32
    %8 = vector.broadcast %cst_5 : f32 to vector<1x128xf32>
    %9 = arith.mulf %7, %8 : vector<1x128xf32>
    %10 = arith.mulf %5, %5 : vector<16x128xf32>
    %cst_6 = arith.constant dense<0.000000e+00> : vector<128xf32>
    %11 = vector.multi_reduction <add>, %10, %cst_6 [0] : vector<16x128xf32> to vector<128xf32>
    %12 = vector.shape_cast %11 : vector<128xf32> to vector<1x128xf32>
    %cst_7 = arith.constant 6.250000e-02 : f32
    %13 = vector.broadcast %cst_7 : f32 to vector<1x128xf32>
    %14 = arith.mulf %12, %13 : vector<1x128xf32>
    %15 = arith.mulf %9, %9 : vector<1x128xf32>
    %16 = arith.subf %14, %15 : vector<1x128xf32>
    %cst_8 = arith.constant 0.000000e+00 : f32
    %17 = vector.broadcast %cst_8 : f32 to vector<1x128xf32>
    %18 = arith.maximumf %16, %17 : vector<1x128xf32>
    %c0_9 = arith.constant 0 : index
    %c0_10 = arith.constant 0 : index
    %19 = vector.load %arg4[%c0_9, %c0_10] : memref<1x128xf32, #tpu.memory_space<vmem>>, vector<1x128xf32>
    %cst_11 = arith.constant 9.99999974E-6 : f32
    %20 = vector.broadcast %cst_11 : f32 to vector<1x128xf32>
    %21 = arith.addf %18, %20 : vector<1x128xf32>
    %22 = math.rsqrt %21 : vector<1x128xf32>
    %23 = arith.mulf %19, %22 : vector<1x128xf32>
    %c0_12 = arith.constant 0 : index
    %c0_13 = arith.constant 0 : index
    %24 = vector.load %arg5[%c0_12, %c0_13] : memref<1x128xf32, #tpu.memory_space<vmem>>, vector<1x128xf32>
    %25 = arith.mulf %9, %23 : vector<1x128xf32>
    %26 = arith.subf %24, %25 : vector<1x128xf32>
    %27 = vector.broadcast %23 : vector<1x128xf32> to vector<16x128xf32>
    %28 = arith.mulf %5, %27 : vector<16x128xf32>
    %29 = vector.broadcast %26 : vector<1x128xf32> to vector<16x128xf32>
    %30 = arith.addf %28, %29 : vector<16x128xf32>
    %cst_14 = arith.constant 0.000000e+00 : f32
    %31 = vector.broadcast %cst_14 : f32 to vector<16x128xf32>
    %32 = arith.maximumf %30, %31 : vector<16x128xf32>
    %c0_15 = arith.constant 0 : index
    %c0_16 = arith.constant 0 : index
    %c0_17 = arith.constant 0 : index
    %33 = vector.load %arg7[%c0_15, %c0_16, %c0_17] : memref<1x16x32xf32, #tpu.memory_space<vmem>>, vector<1x16x32xf32>
    %34 = vector.shape_cast %33 : vector<1x16x32xf32> to vector<16x32xf32>
    %c0_18 = arith.constant 0 : index
    %c0_19 = arith.constant 0 : index
    %35 = vector.load %arg6[%c0_18, %c0_19] : memref<128x32xf32, #tpu.memory_space<vmem>>, vector<128x32xf32>
    %cst_20 = arith.constant dense<0.000000e+00> : vector<16x32xf32>
    %36 = tpu.matmul %32, %35, %cst_20 {dimension_numbers = #tpu.dot_dimension_numbers<[1], [0], [0], [1], [0, 0, 1, 1], [], []>} : vector<16x128xf32>, vector<128x32xf32>, vector<16x32xf32> -> vector<16x32xf32>
    %37 = arith.addf %34, %36 : vector<16x32xf32>
    %c0_21 = arith.constant 0 : index
    %c0_22 = arith.constant 0 : index
    %c0_23 = arith.constant 0 : index
    %38 = vector.load %arg7[%c0_21, %c0_22, %c0_23] : memref<1x16x32xf32, #tpu.memory_space<vmem>>, vector<1x16x32xf32>
    %39 = vector.shape_cast %38 : vector<1x16x32xf32> to vector<16x32xf32>
    %40 = vector.shape_cast %37 : vector<16x32xf32> to vector<1x16x32xf32>
    tpu.vector_store %arg7[%c0_21, %c0_22, %c0_23], %40 {strides = array<i32>} : memref<1x16x32xf32, #tpu.memory_space<vmem>>, vector<1x16x32xf32>,
    return
  }
  func.func @transform_0(%arg0: i32, %arg1: i32) -> (i32, i32) {
    %c0_i32 = arith.constant 0 : i32
    %c0_i32_0 = arith.constant 0 : i32
    %c0_i32_1 = arith.constant 0 : i32
    return %c0_i32, %c0_i32_0 : i32, i32
  }
  func.func @transform_1(%arg0: i32, %arg1: i32) -> (i32, i32) {
    %c2_i32 = arith.constant 2 : i32
    %0 = arith.muli %arg0, %c2_i32 : i32
    %1 = arith.addi %0, %arg1 : i32
    %c0_i32 = arith.constant 0 : i32
    %c0_i32_0 = arith.constant 0 : i32
    return %c0_i32, %1 : i32, i32
  }
  func.func @transform_2(%arg0: i32, %arg1: i32) -> (i32, i32) {
    %c2_i32 = arith.constant 2 : i32
    %0 = arith.muli %arg0, %c2_i32 : i32
    %1 = arith.addi %0, %arg1 : i32
    %c0_i32 = arith.constant 0 : i32
    %c0_i32_0 = arith.constant 0 : i32
    return %c0_i32, %1 : i32, i32
  }
  func.func @transform_3(%arg0: i32, %arg1: i32) -> (i32, i32) {
    %c2_i32 = arith.constant 2 : i32
    %0 = arith.muli %arg0, %c2_i32 : i32
    %1 = arith.addi %0, %arg1 : i32
    %c0_i32 = arith.constant 0 : i32
    %c0_i32_0 = arith.constant 0 : i32
    return %c0_i32, %1 : i32, i32
  }
  func.func @transform_4(%arg0: i32, %arg1: i32) -> (i32, i32) {
    %c2_i32 = arith.constant 2 : i32
    %0 = arith.muli %arg0, %c2_i32 : i32
    %1 = arith.addi %0, %arg1 : i32
    %c0_i32 = arith.constant 0 : i32
    %c0_i32_0 = arith.constant 0 : i32
    return %1, %c0_i32 : i32, i32
  }
  func.func @transform_5(%arg0: i32, %arg1: i32) -> (i32, i32, i32) {
    %c0_i32 = arith.constant 0 : i32
    %c0_i32_0 = arith.constant 0 : i32
    %c0_i32_1 = arith.constant 0 : i32
    return %arg0, %c0_i32, %c0_i32_0 : i32, i32, i32
  }
}

module attributes {stable_mosaic.version = 11 : i64} {
  func.func @projection_kernel(%arg0: i32, %arg1: i32, %arg2: memref<16x64xf32, #tpu.memory_space<vmem>>, %arg3: memref<64x128xf32, #tpu.memory_space<vmem>>, %arg4: memref<1x128xf32, #tpu.memory_space<vmem>>, %arg5: memref<1x128xf32, #tpu.memory_space<vmem>>, %arg6: memref<128x32xf32, #tpu.memory_space<vmem>>, %arg7: memref<1x16x32xf32, #tpu.memory_space<vmem>>) attributes {dimension_semantics = [#tpu.dimension_semantics<parallel>, #tpu.dimension_semantics<arbitrary>], iteration_bounds = array<i64: 2, 2>, scalar_prefetch = 0 : i64, scratch_operands = 0 : i64, tpu.core_type = #tpu.core_type<tc>, window_params = [{pipeline_mode = #tpu.pipeline_mode<synchronous>, transform_indices = @transform_0, window_bounds = array<i64: 16, 64>}, {transform_indices = @transform_1, window_bounds = array<i64: 64, 128>}, {transform_indices = @transform_2, window_bounds = array<i64: 1, 128>}, {transform_indices = @transform_3, window_bounds = array<i64: 1, 128>}, {transform_indices = @transform_4, window_bounds = array<i64: 128, 32>}, {transform_indices = @transform_5, window_bounds = array<i64: 1, 16, 32>}]} {
    %c0_i32 = arith.constant 0 : i32
    %0 = arith.cmpi eq, %arg1, %c0_i32 : i32
    %1 = arith.extui %0 : i1 to i32
    %c0_i32_0 = arith.constant 0 : i32
    %2 = arith.cmpi ne, %1, %c0_i32_0 : i32
    scf.if %2 {
      %cst_24 = arith.constant 0.000000e+00 : f32
      %41 = vector.broadcast %cst_24 : f32 to vector<16x32xf32>
      %c0_25 = arith.constant 0 : index
      %c0_26 = arith.constant 0 : index
      %c0_27 = arith.constant 0 : index
      %42 = vector.load %arg7[%c0_25, %c0_26, %c0_27] : memref<1x16x32xf32, #tpu.memory_space<vmem>>, vector<1x16x32xf32>
      %43 = vector.shape_cast %42 : vector<1x16x32xf32> to vector<16x32xf32>
      %44 = vector.shape_cast %41 : vector<16x32xf32> to vector<1x16x32xf32>
      tpu.vector_store %arg7[%c0_25, %c0_26, %c0_27], %44 {strides = array<i32>} : memref<1x16x32xf32, #tpu.memory_space<vmem>>, vector<1x16x32xf32>,
    } else {
    }
    %c0 = arith.constant 0 : index
    %c0_1 = arith.constant 0 : index
    %3 = vector.load %arg2[%c0, %c0_1] : memref<16x64xf32, #tpu.memory_space<vmem>>, vector<16x64xf32>
    %c0_2 = arith.constant 0 : index
    %c0_3 = arith.constant 0 : index
    %4 = vector.load %arg3[%c0_2, %c0_3] : memref<64x128xf32, #tpu.memory_space<vmem>>, vector<64x128xf32>
    %cst = arith.constant dense<0.000000e+00> : vector<16x128xf32>
    %5 = tpu.matmul %3, %4, %cst {dimension_numbers = #tpu.dot_dimension_numbers<[1], [0], [0], [1], [0, 0, 1, 1], [], []>} : vector<16x64xf32>, vector<64x128xf32>, vector<16x128xf32> -> vector<16x128xf32>
    %cst_4 = arith.constant dense<0.000000e+00> : vector<128xf32>
    %6 = vector.multi_reduction <add>, %5, %cst_4 [0] : vector<16x128xf32> to vector<128xf32>
    %7 = vector.shape_cast %6 : vector<128xf32> to vector<1x128xf32>
    %cst_5 = arith.constant 6.250000e-02 : f32
    %8 = vector.broadcast %cst_5 : f32 to vector<1x128xf32>
    %9 = arith.mulf %7, %8 : vector<1x128xf32>
    %10 = arith.mulf %5, %5 : vector<16x128xf32>
    %cst_6 = arith.constant dense<0.000000e+00> : vector<128xf32>
    %11 = vector.multi_reduction <add>, %10, %cst_6 [0] : vector<16x128xf32> to vector<128xf32>
    %12 = vector.shape_cast %11 : vector<128xf32> to vector<1x128xf32>
    %cst_7 = arith.constant 6.250000e-02 : f32
    %13 = vector.broadcast %cst_7 : f32 to vector<1x128xf32>
    %14 = arith.mulf %12, %13 : vector<1x128xf32>
    %15 = arith.mulf %9, %9 : vector<1x128xf32>
    %16 = arith.subf %14, %15 : vector<1x128xf32>
    %cst_8 = arith.constant 0.000000e+00 : f32
    %17 = vector.broadcast %cst_8 : f32 to vector<1x128xf32>
    %18 = arith.maximumf %16, %17 : vector<1x128xf32>
    %c0_9 = arith.constant 0 : index
    %c0_10 = arith.constant 0 : index
    %19 = vector.load %arg4[%c0_9, %c0_10] : memref<1x128xf32, #tpu.memory_space<vmem>>, vector<1x128xf32>
    %cst_11 = arith.constant 9.99999974E-6 : f32
    %20 = vector.broadcast %cst_11 : f32 to vector<1x128xf32>
    %21 = arith.addf %18, %20 : vector<1x128xf32>
    %22 = math.rsqrt %21 : vector<1x128xf32>
    %23 = arith.mulf %19, %22 : vector<1x128xf32>
    %c0_12 = arith.constant 0 : index
    %c0_13 = arith.constant 0 : index
    %24 = vector.load %arg5[%c0_12, %c0_13] : memref<1x128xf32, #tpu.memory_space<vmem>>, vector<1x128xf32>
    %25 = arith.mulf %9, %23 : vector<1x128xf32>
    %26 = arith.subf %24, %25 : vector<1x128xf32>
    %27 = vector.broadcast %23 : vector<1x128xf32> to vector<16x128xf32>
    %28 = arith.mulf %5, %27 : vector<16x128xf32>
    %29 = vector.broadcast %26 : vector<1x128xf32> to vector<16x128xf32>
    %30 = arith.addf %28, %29 : vector<16x128xf32>
    %cst_14 = arith.constant 0.000000e+00 : f32
    %31 = vector.broadcast %cst_14 : f32 to vector<16x128xf32>
    %32 = arith.maximumf %30, %31 : vector<16x128xf32>
    %c0_15 = arith.constant 0 : index
    %c0_16 = arith.constant 0 : index
    %c0_17 = arith.constant 0 : index
    %33 = vector.load %arg7[%c0_15, %c0_16, %c0_17] : memref<1x16x32xf32, #tpu.memory_space<vmem>>, vector<1x16x32xf32>
    %34 = vector.shape_cast %33 : vector<1x16x32xf32> to vector<16x32xf32>
    %c0_18 = arith.constant 0 : index
    %c0_19 = arith.constant 0 : index
    %35 = vector.load %arg6[%c0_18, %c0_19] : memref<128x32xf32, #tpu.memory_space<vmem>>, vector<128x32xf32>
    %cst_20 = arith.constant dense<0.000000e+00> : vector<16x32xf32>
    %36 = tpu.matmul %32, %35, %cst_20 {dimension_numbers = #tpu.dot_dimension_numbers<[1], [0], [0], [1], [0, 0, 1, 1], [], []>} : vector<16x128xf32>, vector<128x32xf32>, vector<16x32xf32> -> vector<16x32xf32>
    %37 = arith.addf %34, %36 : vector<16x32xf32>
    %c0_21 = arith.constant 0 : index
    %c0_22 = arith.constant 0 : index
    %c0_23 = arith.constant 0 : index
    %38 = vector.load %arg7[%c0_21, %c0_22, %c0_23] : memref<1x16x32xf32, #tpu.memory_space<vmem>>, vector<1x16x32xf32>
    %39 = vector.shape_cast %38 : vector<1x16x32xf32> to vector<16x32xf32>
    %40 = vector.shape_cast %37 : vector<16x32xf32> to vector<1x16x32xf32>
    tpu.vector_store %arg7[%c0_21, %c0_22, %c0_23], %40 {strides = array<i32>} : memref<1x16x32xf32, #tpu.memory_space<vmem>>, vector<1x16x32xf32>,
    return
  }
  func.func @transform_0(%arg0: i32, %arg1: i32) -> (i32, i32) {
    %c0_i32 = arith.constant 0 : i32
    %c0_i32_0 = arith.constant 0 : i32
    %c0_i32_1 = arith.constant 0 : i32
    return %c0_i32, %c0_i32_0 : i32, i32
  }
  func.func @transform_1(%arg0: i32, %arg1: i32) -> (i32, i32) {
    %c2_i32 = arith.constant 2 : i32
    %0 = arith.muli %arg0, %c2_i32 : i32
    %1 = arith.addi %0, %arg1 : i32
    %c0_i32 = arith.constant 0 : i32
    %c0_i32_0 = arith.constant 0 : i32
    return %c0_i32, %1 : i32, i32
  }
  func.func @transform_2(%arg0: i32, %arg1: i32) -> (i32, i32) {
    %c2_i32 = arith.constant 2 : i32
    %0 = arith.muli %arg0, %c2_i32 : i32
    %1 = arith.addi %0, %arg1 : i32
    %c0_i32 = arith.constant 0 : i32
    %c0_i32_0 = arith.constant 0 : i32
    return %c0_i32, %1 : i32, i32
  }
  func.func @transform_3(%arg0: i32, %arg1: i32) -> (i32, i32) {
    %c2_i32 = arith.constant 2 : i32
    %0 = arith.muli %arg0, %c2_i32 : i32
    %1 = arith.addi %0, %arg1 : i32
    %c0_i32 = arith.constant 0 : i32
    %c0_i32_0 = arith.constant 0 : i32
    return %c0_i32, %1 : i32, i32
  }
  func.func @transform_4(%arg0: i32, %arg1: i32) -> (i32, i32) {
    %c2_i32 = arith.constant 2 : i32
    %0 = arith.muli %arg0, %c2_i32 : i32
    %1 = arith.addi %0, %arg1 : i32
    %c0_i32 = arith.constant 0 : i32
    %c0_i32_0 = arith.constant 0 : i32
    return %1, %c0_i32 : i32, i32
  }
  func.func @transform_5(%arg0: i32, %arg1: i32) -> (i32, i32, i32) {
    %c0_i32 = arith.constant 0 : i32
    %c0_i32_0 = arith.constant 0 : i32
    %c0_i32_1 = arith.constant 0 : i32
    return %arg0, %c0_i32, %c0_i32_0 : i32, i32, i32
  }
}

</mosaic_0001>

<bundles_post_ra>
// kernel: projection_forward.1
= control target key start
LH: loop header
LB: loop body
LE: loop exit
PB: predicated region body
PF: predicated region fallthrough
CT: control target
= control target key end

     0   :  { %s995_s0 = inlined_call_operand.vmem [shape: f32[16,64], index: 0, kind: input, shape index: {}]   ;;  %s996_s1 = inlined_call_operand.vmem [shape: f32[64,512], index: 1, kind: input, shape index: {}]   ;;  %s997_s2 = inlined_call_operand.vmem [shape: f32[1,512], index: 2, kind: input, shape index: {}]   ;;  %s998_s3 = inlined_call_operand.vmem [shape: f32[1,512], index: 3, kind: input, shape index: {}]   ;;  %s999_s4 = inlined_call_operand.vmem [shape: f32[512,32], index: 4, kind: input, shape index: {}]   ;;  %s1000_s5 = inlined_call_operand.vmem [shape: f32[2,16,32], index: 5, kind: output, shape index: {}]  }
   0x1   :  { %1001 = sst [smem:[#allocation3_spill]] %s996_s1 }
   0x2   :  { %s838_s18 = smov 0   ;;  %s840_s19 = smov 0  }
   0x3   :  { %s842_s20 = smov 0   ;;  %s844_s21 = smov 0  }
   0x4   :  { %s846_s22 = smov 0   ;;  %s848_s23 = smov 0  }
   0x5   :  { %s850_s24 = smov 0  }
   0x6 LB: > { %s24_s25 = sadd.s32 1, %s797_s22  ;;  %s27_s26 = sadd.s32 1, %s801_s23  ;;  %s805_s24 = sphi %s850_s24, %s15_s24   ;;  %s801_s23 = sphi %s848_s23, %s1008_s23   ;;  %s797_s22 = sphi %s846_s22, %s1007_s22   ;;  %s793_s21 = sphi %s844_s21, %s1006_s21   ;;  %s789_s20 = sphi %s842_s20, %s1005_s20   ;;  %s785_s19 = sphi %s840_s19, %s1004_s19   ;;  %s781_s18 = sphi %s838_s18, %s1003_s18  }
   0x7   : > { %p25_p0 = scmp.ge.s32.totalorder %s24_s25, 2  ;;  %p66_p1 = scmp.ne.s32.totalorder %s785_s19, %s781_s18 }
   0x8   : > { %p67_p2 = scmp.eq.s32.totalorder %s805_s24, 0  ;;  %s648_s27 = sshll.u32 %s801_s23, 1 }
   0x9   : > { %s1010_s25 = smov (%p25_p0, %s24_s25), 0  ;;  %s1012_s26 = smov (!%p25_p0, %s27_s26), %s801_s23 }
   0xa   : > { %p29_p3 = scmp.ge.s32.totalorder %s1012_s26, 2  ;;  %p68_p4 = por %p67_p2, %p66_p1 }
   0xb   : > { %s53_s28 = sadd.s32 %s797_s22, %s648_s27  ;;  %s59_s7 = sadd.s32 1, %s785_s19 }
   0xc   : > { %s1014_s26 = smov (%p29_p3, %s1012_s26), 0  ;;  %p657_p6 = scmp.ge.s32.totalorder %s805_s24, 4 }
   0xd   : > { %s649_s29 = sshll.u32 %s1014_s26, 1 }
   0xe   : > { %s55_s30 = sadd.s32 %s649_s29, %s1010_s25  ;;  %211 = sbr.rel (%p657_p6) target bundleno = 37 (0x25), region = 20 }
   0xf   : > { %s56_s6 = ssub.s32 %s53_s28, %s55_s30 }
  0x10   : > { %p57_p5 = scmp.eq.s32.totalorder %s56_s6, 0 }
  0x12   : > { %s889_s8 = scalar_select %p57_p5, %s785_s19, %s59_s7  }
  0x13   : > { %214 = sbr.rel (!%p68_p4) target bundleno = 37 (0x25), region = 24  ;;  %s216_s9 = sand.u32 (%p68_p4), 1, %s785_s19  }
  0x14   : > { %s660_s10 = sshll.u32 (%p68_p4), %s53_s28, 3  ;;  %s658_s11 = sshll.u32 (%p68_p4), %s216_s9, 6 }
  0x15   : > { %s1002_s1 = sld [smem:[#allocation3_spill]] (%p68_p4)  ;;  %s218_s15 = scalar_lea.vmem (%p68_p4), [#allocation2], %s658_s11 }
  0x1b   : > { %s222_s14 = scalar_lea.vmem %s1002_s1, %s660_s10 }
  0x1c   : > { %v265_v0 = vld [vmem:[%s222_s14] sm:$0xff] }
  0x1d   : > { %v267_v1 = vld [vmem:[%s222_s14 + $0x20] sm:$0xff]  ;;  %266 = vst [vmem:[%s218_s15] sm:$0xff] %v265_v0 }
  0x1e   : > { %v269_v2 = vld [vmem:[%s222_s14 + $0x40] sm:$0xff]  ;;  %268 = vst [vmem:[%s218_s15 + $0x8] sm:$0xff] %v267_v1 }
  0x1f   : > { %v271_v3 = vld [vmem:[%s222_s14 + $0x60] sm:$0xff]  ;;  %270 = vst [vmem:[%s218_s15 + $0x10] sm:$0xff] %v269_v2 }
  0x20   : > { %v273_v4 = vld [vmem:[%s222_s14 + $0x80] sm:$0xff]  ;;  %272 = vst [vmem:[%s218_s15 + $0x18] sm:$0xff] %v271_v3 }
  0x21   : > { %v275_v5 = vld [vmem:[%s222_s14 + $0xa0] sm:$0xff]  ;;  %274 = vst [vmem:[%s218_s15 + $0x20] sm:$0xff] %v273_v4 }
  0x22   : > { %v277_v6 = vld [vmem:[%s222_s14 + $0xc0] sm:$0xff]  ;;  %276 = vst [vmem:[%s218_s15 + $0x28] sm:$0xff] %v275_v5 }
  0x23   : > { %v279_v7 = vld [vmem:[%s222_s14 + $0xe0] sm:$0xff]  ;;  %278 = vst [vmem:[%s218_s15 + $0x30] sm:$0xff] %v277_v6 }
  0x24   : > { %280 = vst [vmem:[%s218_s15 + $0x38] sm:$0xff] %v279_v7 }
  0x25 PF: > { %p661_p7 = scmp.ge.s32.totalorder %s805_s24, 1  ;;  %p318_p8 = scmp.lt.s32.totalorder %s805_s24, 5 }
  0x27   : > { %p319_p9 = pnand %p661_p7, %p318_p8 }
  0x28   : > { %s325_s16 = sand.u32 (!%p319_p9), 1, %s781_s18   ;;  %s663_s17 = sshll.u32 (!%p319_p9), %s793_s21, 1 }
  0x29   : > { %322 = sbr.rel (%p319_p9) target bundleno = 397 (0x18d), region = 74  ;;  %s662_s27 = sshll.u32 (!%p319_p9), %s325_s16, 6 }
  0x2a   : > { %s372_s28 = sadd.s32 (!%p319_p9), %s789_s20, %s663_s17  ;;  %p395_p11 = scmp.lt.s32.totalorder (!%p319_p9), %s793_s21, 1 }
  0x2b   : > { %p373_p10 = scmp.lt.s32.totalorder (!%p319_p9), %s372_s28, 3  ;;  %s666_s29 = sshll.u32 (!%p319_p9), %s372_s28, 4 }
  0x2c   : > { %p388_p12 = scmp.lt.s32.totalorder (!%p319_p9), %s666_s29, 63  ;;  %s327_s30 = scalar_lea.vmem (!%p319_p9), [#allocation2], %s662_s27 }
  0x2d   : > { %p670_p13 = scmp.ne.s32.totalorder (!%p319_p9), %s789_s20, 0 }
  0x2e   : > { %s1016_s28 = smov (!%p373_p10, %s372_s28), 3  ;;  %s1018_s29 = smov (!%p388_p12, %s666_s29), 63 }
  0x2f   : > { %s375_s7 = scalar_lea.vmem %s997_s2, %s1016_s28  ;;  %s382_s11 = scalar_lea.vmem %s998_s3, %s1016_s28 }
  0x30   : > { %s1020_s21 = smov (!%p395_p11, %s793_s21), 1  ;;  %s667_s18 = sshll.u32 %s1018_s29, 3 }
  0x31   : > { %s916_s14 = scalar_lea.vmem %s999_s4, %s667_s18  ;;  %s675_s15 = sshll.u32 %s1020_s21, 4 }
  0x32   : > { %s921_s1 = scalar_lea.vmem %s1000_s5, %s675_s15  ;;  %403 = sbr.rel (%p670_p13) target bundleno = 58 (0x3a), region = 82 }
  0x37   : > { %vm404_vm0 = vcmask 261120   ;;  %v807_v8 = vmov 0.0  }
  0x38   : > { %405 = vst.msk [vmem:[%s921_s1] sm:$0xff] %vm404_vm0, %v807_v8 }
  0x39   : > { %406 = vst.msk [vmem:[%s921_s1 + $0x8] sm:$0xff] %vm404_vm0, %v807_v8 }
  0x3a PF: > { %v416_v9 = vld [vmem:[%s327_s30 + $0x38] sm:$0xff]  ;;  %v415_v10 = vld [vmem:[%s327_s30 + $0x30] sm:$0xff]  ;;  %v414_v11 = vld [vmem:[%s327_s30 + $0x28] sm:$0xff]  ;;  %vm417_vm1 = vcmask 523264   ;;  %vm539_vm5 = vcmask 261120  }
  0x3b   : > { %432 = vmatpush.msra.mxu0 %v416_v9  ;;  %v413_v12 = vld [vmem:[%s327_s30 + $0x20] sm:$0xff]  ;;  %v412_v13 = vld [vmem:[%s327_s30 + $0x18] sm:$0xff]  ;;  %v411_v14 = vld [vmem:[%s327_s30 + $0x10] sm:$0xff] }
  0x3c   : > { %v410_v15 = vld [vmem:[%s327_s30 + $0x8] sm:$0xff]  ;;  %v409_v16 = vld [vmem:[%s327_s30] sm:$0xff]  ;;  %v513_v19 = vld [vmem:[%s916_s14 + $0x78] sm:$0xff] }
  0x3d   : > { %433 = vmatpush.msra.mxu0 %v415_v10  ;;  %v407_v17 = vld [vmem:[%s995_s0] sm:$0xff]  ;;  %v408_v18 = vld [vmem:[%s995_s0 + $0x8] sm:$0xff]  ;;  %514 = vmatpush.msra.mxu1 %v513_v19  ;;  %v512_v21 = vld [vmem:[%s916_s14 + $0x70] sm:$0xff] }
  0x3e   : > { %676 = vmatpush.msra.mxu2 %v513_v19  ;;  %v511_v22 = vld [vmem:[%s916_s14 + $0x68] sm:$0xff]  ;;  %v510_v23 = vld [vmem:[%s916_s14 + $0x60] sm:$0xff]  ;;  %v509_v24 = vld [vmem:[%s916_s14 + $0x58] sm:$0xff] }
  0x3f   : > { %434 = vmatpush.msra.mxu0 %v414_v11  ;;  %515 = vmatpush.msra.mxu1 %v512_v21  ;;  %v508_v29 = vld [vmem:[%s916_s14 + $0x50] sm:$0xff]  ;;  %v507_v32 = vld [vmem:[%s916_s14 + $0x48] sm:$0xff]  ;;  %v506_v35 = vld [vmem:[%s916_s14 + $0x40] sm:$0xff] }
  0x40   : > { %677 = vmatpush.msra.mxu2 %v512_v21  ;;  %v505_v38 = vld [vmem:[%s916_s14 + $0x38] sm:$0xff]  ;;  %v504_v41 = vld [vmem:[%s916_s14 + $0x30] sm:$0xff]  ;;  %v503_v44 = vld [vmem:[%s916_s14 + $0x28] sm:$0xff] }
  0x41   : > { %435 = vmatpush.msra.mxu0 %v413_v12  ;;  %516 = vmatpush.msra.mxu1 %v511_v22  ;;  %v502_v47 = vld [vmem:[%s916_s14 + $0x20] sm:$0xff]  ;;  %v501_v50 = vld [vmem:[%s916_s14 + $0x18] sm:$0xff]  ;;  %v500_v51 = vld [vmem:[%s916_s14 + $0x10] sm:$0xff] }
  0x42   : > { %678 = vmatpush.msra.mxu2 %v511_v22  ;;  %v499_v54 = vld [vmem:[%s916_s14 + $0x8] sm:$0xff]  ;;  %v498_v56 = vld [vmem:[%s916_s14] sm:$0xff] }
  0x43   : > { %436 = vmatpush.msra.mxu0 %v412_v13  ;;  %517 = vmatpush.msra.mxu1 %v510_v23  ;;  %v468_v0 = vld [vmem:[%s375_s7] sm:$0x1] }
  0x44   : > { %679 = vmatpush.msra.mxu2 %v510_v23  ;;  %v481_v4 = vld [vmem:[%s382_s11] sm:$0x1] }
  0x45   : > { %437 = vmatpush.msra.mxu0 %v411_v14  ;;  %518 = vmatpush.msra.mxu1 %v509_v24 }
  0x46   : > { %680 = vmatpush.msra.mxu2 %v509_v24 }
  0x47   : > { %438 = vmatpush.msra.mxu0 %v410_v15  ;;  %519 = vmatpush.msra.mxu1 %v508_v29  ;;  %v496_v15 = vld [vmem:[%s921_s1] sm:$0xff] }
  0x48   : > { %681 = vmatpush.msra.mxu2 %v508_v29 }
  0x49   : > { %439 = vmatpush.msra.mxu0 %v409_v16  ;;  %520 = vmatpush.msra.mxu1 %v507_v32 }
  0x4a   : > { %671 = vmatmul.msk.f32.vlgmr.msra.gmra.mxu0 %vm417_vm1, %v407_v17  ;;  %682 = vmatpush.msra.mxu2 %v507_v32 }
  0x4b   : > { %521 = vmatpush.msra.mxu1 %v506_v35 }
  0x4c   : > { %683 = vmatpush.msra.mxu2 %v506_v35 }
  0x4d   : > { %522 = vmatpush.msra.mxu1 %v505_v38 }
  0x4e   : > { %684 = vmatpush.msra.mxu2 %v505_v38 }
  0x4f   : > { %523 = vmatpush.msra.mxu1 %v504_v41 }
  0x50   : > { %685 = vmatpush.msra.mxu2 %v504_v41 }
  0x51   : > { %524 = vmatpush.msra.mxu1 %v503_v44 }
  0x52   : > { %672 = vmatmul.msk.f32.gmra.mxu0 %vm417_vm1, %v408_v18  ;;  %686 = vmatpush.msra.mxu2 %v503_v44  ;;  %v497_v18 = vld [vmem:[%s921_s1 + $0x8] sm:$0xff] }
  0x53   : > { %525 = vmatpush.msra.mxu1 %v502_v47 }
  0x54   : > { %687 = vmatpush.msra.mxu2 %v502_v47 }
  0x55   : > { %526 = vmatpush.msra.mxu1 %v501_v50 }
  0x56   : > { %688 = vmatpush.msra.mxu2 %v501_v50 }
  0x57   : > { %527 = vmatpush.msra.mxu1 %v500_v51 }
  0x58   : > { %689 = vmatpush.msra.mxu2 %v500_v51 }
  0x59   : > { %528 = vmatpush.msra.mxu1 %v499_v54 }
  0x5a   : > { %690 = vmatpush.msra.mxu2 %v499_v54 }
  0x5b   : > { %529 = vmatpush.msra.mxu1 %v498_v56 }
  0x5c   : > { %691 = vmatpush.msra.mxu2 %v498_v56 }
  0xc7   : > { %v933_v20 = vpop.f32.mrf.mxu0 }
  0xc8   : > { %v455_v26 = vmul.f32 %v933_v20, %v933_v20 }
  0xcf   : > { %v939_v25 = vpop.f32.mrf.mxu0 }
  0xd0   : > { %v447_v27 = vadd.f32 %v939_v25, %v933_v20  ;;  %v456_v28 = vmul.f32 %v939_v25, %v939_v25 }
  0xd2   : > { %v448_v30 = vrot.slane %v447_v27, 4  ;;  %v457_v31 = vadd.f32 %v456_v28, %v455_v26 }
  0xd4   : > { %v449_v33 = vadd.f32 %v448_v30, %v447_v27  ;;  %v458_v34 = vrot.slane %v457_v31, 4 }
  0xd6   : > { %v450_v36 = vrot.slane %v449_v33, 2  ;;  %v459_v37 = vadd.f32 %v458_v34, %v457_v31 }
  0xd8   : > { %v451_v39 = vadd.f32 %v450_v36, %v449_v33  ;;  %v460_v40 = vrot.slane %v459_v37, 2 }
  0xda   : > { %v452_v42 = vrot.slane %v451_v39, 1  ;;  %v461_v43 = vadd.f32 %v460_v40, %v459_v37 }
  0xdc   : > { %v453_v45 = vadd.f32 %v452_v42, %v451_v39  ;;  %v462_v46 = vrot.slane %v461_v43, 1 }
  0xde   : > { %v454_v48 = vmul.f32 0.0625, %v453_v45  ;;  %v463_v49 = vadd.f32 %v462_v46, %v461_v43 }
  0xe0   : > { %v464_v52 = vmul.f32 0.0625, %v463_v49  ;;  %v465_v53 = vmul.f32 %v454_v48, %v454_v48 }
  0xe2   : > { %v466_v55 = vsub.f32 %v464_v52, %v465_v53 }
  0xe4   : > { %v467_v57 = vmax.f32 %v466_v55, 0.0 }
  0xe6   : > { %v469_v58 = vadd.f32 1e-05, %v467_v57 }
  0xe8   : > { %749 = vrsqrt.f32 %v469_v58  ;;  %vm476_vm3 = vweird.f32 %v469_v58 }
  0xee   : > { %v750_v59 = vpop.eup %749 }
  0xef   : > { %v471_v60 = vmul.f32 %v750_v59, %v469_v58  ;;  %vm477_vm2 = vweird.f32 %v750_v59 }
  0xf0   : > { %vm478_vm4 = vmor %vm476_vm3, %vm477_vm2 }
  0xf1   : > { %v472_v61 = vmul.f32 %v750_v59, %v471_v60 }
  0xf3   : > { %v473_v62 = vmul.f32 0.5, %v472_v61 }
  0xf5   : > { %v474_v63 = vsub.f32 1.5, %v473_v62 }
  0xf7   : > { %v475_v1 = vmul.f32 %v750_v59, %v474_v63 }
  0xf9   : > { %v479_v2 = vsel %vm478_vm4, %v750_v59, %v475_v1 }
  0xfa   : > { %v480_v3 = vmul.f32 %v479_v2, %v468_v0 }
  0xfc   : > { %v485_v5 = vperm.slane %v480_v3, 0  ;;  %v482_v6 = vmul.f32 %v480_v3, %v454_v48 }
  0xfe   : > { %v483_v7 = vsub.f32 %v481_v4, %v482_v6  ;;  %v488_v8 = vmul.f32 %v485_v5, %v939_v25  ;;  %v487_v9 = vmul.f32 %v485_v5, %v933_v20 }
 0x100   : > { %v490_v10 = vperm.slane %v483_v7, 0 }
 0x102   : > { %v492_v11 = vadd.f32 %v490_v10, %v487_v9  ;;  %v493_v12 = vadd.f32 %v490_v10, %v488_v8 }
 0x104   : > { %v494_v13 = vmax.f32 %v492_v11, 0.0  ;;  %v495_v14 = vmax.f32 %v493_v12, 0.0 }
 0x106   : > { %530 = vmatmul.f32.vlgmr.msra.gmra.mxu1 %v494_v13  ;;  %533 = vmatmul.f32.vlgmr.msra.gmra.mxu2 %v495_v14 }
 0x183   : > { %v531_v16 = vpop.f32.mrf.mxu1 }
 0x184   : > { %v537_v17 = vadd.f32 %v531_v16, %v496_v15 }
 0x186   : > { %540 = vst.msk [vmem:[%s921_s1] sm:$0xff] %vm539_vm5, %v537_v17 }
 0x189   : > { %v534_v19 = vpop.f32.mrf.mxu2 }
 0x18a   : > { %v538_v21 = vadd.f32 %v534_v19, %v497_v18 }
 0x18c   : > { %541 = vst.msk [vmem:[%s921_s1 + $0x8] sm:$0xff] %vm539_vm5, %v538_v21 }
 0x18d PF: > { %s15_s24 = sadd.s32 1, %s805_s24   ;;  %s1003_s18 = smov %s785_s19 }
 0x18e   : > { %p12_p0 = scmp.ge.s32.totalorder %s15_s24, 6   ;;  %s1004_s19 = smov %s889_s8 }
 0x18f   : > { %s1005_s20 = smov %s797_s22  ;;  %s1006_s21 = smov %s801_s23 }
 0x190   : > { %s1007_s22 = smov %s1010_s25  ;;  %s1008_s23 = smov %s1014_s26 }
 0x191   :  { %14 = sbr.rel (!%p12_p0) target bundleno = 6 (0x6), region = 126 }

// kernel: projection_forward.1
= control target key start
LH: loop header
LB: loop body
LE: loop exit
PB: predicated region body
PF: predicated region fallthrough
CT: control target
= control target key end

     0   :  { %s995_s0 = inlined_call_operand.vmem [shape: f32[16,64], index: 0, kind: input, shape index: {}]   ;;  %s996_s1 = inlined_call_operand.vmem [shape: f32[64,512], index: 1, kind: input, shape index: {}]   ;;  %s997_s2 = inlined_call_operand.vmem [shape: f32[1,512], index: 2, kind: input, shape index: {}]   ;;  %s998_s3 = inlined_call_operand.vmem [shape: f32[1,512], index: 3, kind: input, shape index: {}]   ;;  %s999_s4 = inlined_call_operand.vmem [shape: f32[512,32], index: 4, kind: input, shape index: {}]   ;;  %s1000_s5 = inlined_call_operand.vmem [shape: f32[2,16,32], index: 5, kind: output, shape index: {}]  }
   0x1   :  { %1001 = sst [smem:[#allocation3_spill]] %s996_s1 }
   0x2   :  { %s838_s18 = smov 0   ;;  %s840_s19 = smov 0  }
   0x3   :  { %s842_s20 = smov 0   ;;  %s844_s21 = smov 0  }
   0x4   :  { %s846_s22 = smov 0   ;;  %s848_s23 = smov 0  }
   0x5   :  { %s850_s24 = smov 0  }
   0x6 LB: > { %s24_s25 = sadd.s32 1, %s797_s22  ;;  %s27_s26 = sadd.s32 1, %s801_s23  ;;  %s805_s24 = sphi %s850_s24, %s15_s24   ;;  %s801_s23 = sphi %s848_s23, %s1008_s23   ;;  %s797_s22 = sphi %s846_s22, %s1007_s22   ;;  %s793_s21 = sphi %s844_s21, %s1006_s21   ;;  %s789_s20 = sphi %s842_s20, %s1005_s20   ;;  %s785_s19 = sphi %s840_s19, %s1004_s19   ;;  %s781_s18 = sphi %s838_s18, %s1003_s18  }
   0x7   : > { %p25_p0 = scmp.ge.s32.totalorder %s24_s25, 2  ;;  %p66_p1 = scmp.ne.s32.totalorder %s785_s19, %s781_s18 }
   0x8   : > { %p67_p2 = scmp.eq.s32.totalorder %s805_s24, 0  ;;  %s648_s27 = sshll.u32 %s801_s23, 1 }
   0x9   : > { %s1010_s25 = smov (%p25_p0, %s24_s25), 0  ;;  %s1012_s26 = smov (!%p25_p0, %s27_s26), %s801_s23 }
   0xa   : > { %p29_p3 = scmp.ge.s32.totalorder %s1012_s26, 2  ;;  %p68_p4 = por %p67_p2, %p66_p1 }
   0xb   : > { %s53_s28 = sadd.s32 %s797_s22, %s648_s27  ;;  %s59_s7 = sadd.s32 1, %s785_s19 }
   0xc   : > { %s1014_s26 = smov (%p29_p3, %s1012_s26), 0  ;;  %p657_p6 = scmp.ge.s32.totalorder %s805_s24, 4 }
   0xd   : > { %s649_s29 = sshll.u32 %s1014_s26, 1 }
   0xe   : > { %s55_s30 = sadd.s32 %s649_s29, %s1010_s25  ;;  %211 = sbr.rel (%p657_p6) target bundleno = 37 (0x25), region = 20 }
   0xf   : > { %s56_s6 = ssub.s32 %s53_s28, %s55_s30 }
  0x10   : > { %p57_p5 = scmp.eq.s32.totalorder %s56_s6, 0 }
  0x12   : > { %s889_s8 = scalar_select %p57_p5, %s785_s19, %s59_s7  }
  0x13   : > { %214 = sbr.rel (!%p68_p4) target bundleno = 37 (0x25), region = 24  ;;  %s216_s9 = sand.u32 (%p68_p4), 1, %s785_s19  }
  0x14   : > { %s660_s10 = sshll.u32 (%p68_p4), %s53_s28, 3  ;;  %s658_s11 = sshll.u32 (%p68_p4), %s216_s9, 6 }
  0x15   : > { %s1002_s1 = sld [smem:[#allocation3_spill]] (%p68_p4)  ;;  %s218_s15 = scalar_lea.vmem (%p68_p4), [#allocation2], %s658_s11 }
  0x1b   : > { %s222_s14 = scalar_lea.vmem %s1002_s1, %s660_s10 }
  0x1c   : > { %v265_v0 = vld [vmem:[%s222_s14] sm:$0xff] }
  0x1d   : > { %v267_v1 = vld [vmem:[%s222_s14 + $0x20] sm:$0xff]  ;;  %266 = vst [vmem:[%s218_s15] sm:$0xff] %v265_v0 }
  0x1e   : > { %v269_v2 = vld [vmem:[%s222_s14 + $0x40] sm:$0xff]  ;;  %268 = vst [vmem:[%s218_s15 + $0x8] sm:$0xff] %v267_v1 }
  0x1f   : > { %v271_v3 = vld [vmem:[%s222_s14 + $0x60] sm:$0xff]  ;;  %270 = vst [vmem:[%s218_s15 + $0x10] sm:$0xff] %v269_v2 }
  0x20   : > { %v273_v4 = vld [vmem:[%s222_s14 + $0x80] sm:$0xff]  ;;  %272 = vst [vmem:[%s218_s15 + $0x18] sm:$0xff] %v271_v3 }
  0x21   : > { %v275_v5 = vld [vmem:[%s222_s14 + $0xa0] sm:$0xff]  ;;  %274 = vst [vmem:[%s218_s15 + $0x20] sm:$0xff] %v273_v4 }
  0x22   : > { %v277_v6 = vld [vmem:[%s222_s14 + $0xc0] sm:$0xff]  ;;  %276 = vst [vmem:[%s218_s15 + $0x28] sm:$0xff] %v275_v5 }
  0x23   : > { %v279_v7 = vld [vmem:[%s222_s14 + $0xe0] sm:$0xff]  ;;  %278 = vst [vmem:[%s218_s15 + $0x30] sm:$0xff] %v277_v6 }
  0x24   : > { %280 = vst [vmem:[%s218_s15 + $0x38] sm:$0xff] %v279_v7 }
  0x25 PF: > { %p661_p7 = scmp.ge.s32.totalorder %s805_s24, 1  ;;  %p318_p8 = scmp.lt.s32.totalorder %s805_s24, 5 }
  0x27   : > { %p319_p9 = pnand %p661_p7, %p318_p8 }
  0x28   : > { %s325_s16 = sand.u32 (!%p319_p9), 1, %s781_s18   ;;  %s663_s17 = sshll.u32 (!%p319_p9), %s793_s21, 1 }
  0x29   : > { %322 = sbr.rel (%p319_p9) target bundleno = 397 (0x18d), region = 74  ;;  %s662_s27 = sshll.u32 (!%p319_p9), %s325_s16, 6 }
  0x2a   : > { %s372_s28 = sadd.s32 (!%p319_p9), %s789_s20, %s663_s17  ;;  %p395_p11 = scmp.lt.s32.totalorder (!%p319_p9), %s793_s21, 1 }
  0x2b   : > { %p373_p10 = scmp.lt.s32.totalorder (!%p319_p9), %s372_s28, 3  ;;  %s666_s29 = sshll.u32 (!%p319_p9), %s372_s28, 4 }
  0x2c   : > { %p388_p12 = scmp.lt.s32.totalorder (!%p319_p9), %s666_s29, 63  ;;  %s327_s30 = scalar_lea.vmem (!%p319_p9), [#allocation2], %s662_s27 }
  0x2d   : > { %p670_p13 = scmp.ne.s32.totalorder (!%p319_p9), %s789_s20, 0 }
  0x2e   : > { %s1016_s28 = smov (!%p373_p10, %s372_s28), 3  ;;  %s1018_s29 = smov (!%p388_p12, %s666_s29), 63 }
  0x2f   : > { %s375_s7 = scalar_lea.vmem %s997_s2, %s1016_s28  ;;  %s382_s11 = scalar_lea.vmem %s998_s3, %s1016_s28 }
  0x30   : > { %s1020_s21 = smov (!%p395_p11, %s793_s21), 1  ;;  %s667_s18 = sshll.u32 %s1018_s29, 3 }
  0x31   : > { %s916_s14 = scalar_lea.vmem %s999_s4, %s667_s18  ;;  %s675_s15 = sshll.u32 %s1020_s21, 4 }
  0x32   : > { %s921_s1 = scalar_lea.vmem %s1000_s5, %s675_s15  ;;  %403 = sbr.rel (%p670_p13) target bundleno = 58 (0x3a), region = 82 }
  0x37   : > { %vm404_vm0 = vcmask 261120   ;;  %v807_v8 = vmov 0.0  }
  0x38   : > { %405 = vst.msk [vmem:[%s921_s1] sm:$0xff] %vm404_vm0, %v807_v8 }
  0x39   : > { %406 = vst.msk [vmem:[%s921_s1 + $0x8] sm:$0xff] %vm404_vm0, %v807_v8 }
  0x3a PF: > { %v416_v9 = vld [vmem:[%s327_s30 + $0x38] sm:$0xff]  ;;  %v415_v10 = vld [vmem:[%s327_s30 + $0x30] sm:$0xff]  ;;  %v414_v11 = vld [vmem:[%s327_s30 + $0x28] sm:$0xff]  ;;  %vm417_vm1 = vcmask 523264   ;;  %vm539_vm5 = vcmask 261120  }
  0x3b   : > { %432 = vmatpush.msra.mxu0 %v416_v9  ;;  %v413_v12 = vld [vmem:[%s327_s30 + $0x20] sm:$0xff]  ;;  %v412_v13 = vld [vmem:[%s327_s30 + $0x18] sm:$0xff]  ;;  %v411_v14 = vld [vmem:[%s327_s30 + $0x10] sm:$0xff] }
  0x3c   : > { %v410_v15 = vld [vmem:[%s327_s30 + $0x8] sm:$0xff]  ;;  %v409_v16 = vld [vmem:[%s327_s30] sm:$0xff]  ;;  %v513_v19 = vld [vmem:[%s916_s14 + $0x78] sm:$0xff] }
  0x3d   : > { %433 = vmatpush.msra.mxu0 %v415_v10  ;;  %v407_v17 = vld [vmem:[%s995_s0] sm:$0xff]  ;;  %v408_v18 = vld [vmem:[%s995_s0 + $0x8] sm:$0xff]  ;;  %514 = vmatpush.msra.mxu1 %v513_v19  ;;  %v512_v21 = vld [vmem:[%s916_s14 + $0x70] sm:$0xff] }
  0x3e   : > { %676 = vmatpush.msra.mxu2 %v513_v19  ;;  %v511_v22 = vld [vmem:[%s916_s14 + $0x68] sm:$0xff]  ;;  %v510_v23 = vld [vmem:[%s916_s14 + $0x60] sm:$0xff]  ;;  %v509_v24 = vld [vmem:[%s916_s14 + $0x58] sm:$0xff] }
  0x3f   : > { %434 = vmatpush.msra.mxu0 %v414_v11  ;;  %515 = vmatpush.msra.mxu1 %v512_v21  ;;  %v508_v29 = vld [vmem:[%s916_s14 + $0x50] sm:$0xff]  ;;  %v507_v32 = vld [vmem:[%s916_s14 + $0x48] sm:$0xff]  ;;  %v506_v35 = vld [vmem:[%s916_s14 + $0x40] sm:$0xff] }
  0x40   : > { %677 = vmatpush.msra.mxu2 %v512_v21  ;;  %v505_v38 = vld [vmem:[%s916_s14 + $0x38] sm:$0xff]  ;;  %v504_v41 = vld [vmem:[%s916_s14 + $0x30] sm:$0xff]  ;;  %v503_v44 = vld [vmem:[%s916_s14 + $0x28] sm:$0xff] }
  0x41   : > { %435 = vmatpush.msra.mxu0 %v413_v12  ;;  %516 = vmatpush.msra.mxu1 %v511_v22  ;;  %v502_v47 = vld [vmem:[%s916_s14 + $0x20] sm:$0xff]  ;;  %v501_v50 = vld [vmem:[%s916_s14 + $0x18] sm:$0xff]  ;;  %v500_v51 = vld [vmem:[%s916_s14 + $0x10] sm:$0xff] }
  0x42   : > { %678 = vmatpush.msra.mxu2 %v511_v22  ;;  %v499_v54 = vld [vmem:[%s916_s14 + $0x8] sm:$0xff]  ;;  %v498_v56 = vld [vmem:[%s916_s14] sm:$0xff] }
  0x43   : > { %436 = vmatpush.msra.mxu0 %v412_v13  ;;  %517 = vmatpush.msra.mxu1 %v510_v23  ;;  %v468_v0 = vld [vmem:[%s375_s7] sm:$0x1] }
  0x44   : > { %679 = vmatpush.msra.mxu2 %v510_v23  ;;  %v481_v4 = vld [vmem:[%s382_s11] sm:$0x1] }
  0x45   : > { %437 = vmatpush.msra.mxu0 %v411_v14  ;;  %518 = vmatpush.msra.mxu1 %v509_v24 }
  0x46   : > { %680 = vmatpush.msra.mxu2 %v509_v24 }
  0x47   : > { %438 = vmatpush.msra.mxu0 %v410_v15  ;;  %519 = vmatpush.msra.mxu1 %v508_v29  ;;  %v496_v15 = vld [vmem:[%s921_s1] sm:$0xff] }
  0x48   : > { %681 = vmatpush.msra.mxu2 %v508_v29 }
  0x49   : > { %439 = vmatpush.msra.mxu0 %v409_v16  ;;  %520 = vmatpush.msra.mxu1 %v507_v32 }
  0x4a   : > { %671 = vmatmul.msk.f32.vlgmr.msra.gmra.mxu0 %vm417_vm1, %v407_v17  ;;  %682 = vmatpush.msra.mxu2 %v507_v32 }
  0x4b   : > { %521 = vmatpush.msra.mxu1 %v506_v35 }
  0x4c   : > { %683 = vmatpush.msra.mxu2 %v506_v35 }
  0x4d   : > { %522 = vmatpush.msra.mxu1 %v505_v38 }
  0x4e   : > { %684 = vmatpush.msra.mxu2 %v505_v38 }
  0x4f   : > { %523 = vmatpush.msra.mxu1 %v504_v41 }
  0x50   : > { %685 = vmatpush.msra.mxu2 %v504_v41 }
  0x51   : > { %524 = vmatpush.msra.mxu1 %v503_v44 }
  0x52   : > { %672 = vmatmul.msk.f32.gmra.mxu0 %vm417_vm1, %v408_v18  ;;  %686 = vmatpush.msra.mxu2 %v503_v44  ;;  %v497_v18 = vld [vmem:[%s921_s1 + $0x8] sm:$0xff] }
  0x53   : > { %525 = vmatpush.msra.mxu1 %v502_v47 }
  0x54   : > { %687 = vmatpush.msra.mxu2 %v502_v47 }
  0x55   : > { %526 = vmatpush.msra.mxu1 %v501_v50 }
  0x56   : > { %688 = vmatpush.msra.mxu2 %v501_v50 }
  0x57   : > { %527 = vmatpush.msra.mxu1 %v500_v51 }
  0x58   : > { %689 = vmatpush.msra.mxu2 %v500_v51 }
  0x59   : > { %528 = vmatpush.msra.mxu1 %v499_v54 }
  0x5a   : > { %690 = vmatpush.msra.mxu2 %v499_v54 }
  0x5b   : > { %529 = vmatpush.msra.mxu1 %v498_v56 }
  0x5c   : > { %691 = vmatpush.msra.mxu2 %v498_v56 }
  0xc7   : > { %v933_v20 = vpop.f32.mrf.mxu0 }
  0xc8   : > { %v455_v26 = vmul.f32 %v933_v20, %v933_v20 }
  0xcf   : > { %v939_v25 = vpop.f32.mrf.mxu0 }
  0xd0   : > { %v447_v27 = vadd.f32 %v939_v25, %v933_v20  ;;  %v456_v28 = vmul.f32 %v939_v25, %v939_v25 }
  0xd2   : > { %v448_v30 = vrot.slane %v447_v27, 4  ;;  %v457_v31 = vadd.f32 %v456_v28, %v455_v26 }
  0xd4   : > { %v449_v33 = vadd.f32 %v448_v30, %v447_v27  ;;  %v458_v34 = vrot.slane %v457_v31, 4 }
  0xd6   : > { %v450_v36 = vrot.slane %v449_v33, 2  ;;  %v459_v37 = vadd.f32 %v458_v34, %v457_v31 }
  0xd8   : > { %v451_v39 = vadd.f32 %v450_v36, %v449_v33  ;;  %v460_v40 = vrot.slane %v459_v37, 2 }
  0xda   : > { %v452_v42 = vrot.slane %v451_v39, 1  ;;  %v461_v43 = vadd.f32 %v460_v40, %v459_v37 }
  0xdc   : > { %v453_v45 = vadd.f32 %v452_v42, %v451_v39  ;;  %v462_v46 = vrot.slane %v461_v43, 1 }
  0xde   : > { %v454_v48 = vmul.f32 0.0625, %v453_v45  ;;  %v463_v49 = vadd.f32 %v462_v46, %v461_v43 }
  0xe0   : > { %v464_v52 = vmul.f32 0.0625, %v463_v49  ;;  %v465_v53 = vmul.f32 %v454_v48, %v454_v48 }
  0xe2   : > { %v466_v55 = vsub.f32 %v464_v52, %v465_v53 }
  0xe4   : > { %v467_v57 = vmax.f32 %v466_v55, 0.0 }
  0xe6   : > { %v469_v58 = vadd.f32 1e-05, %v467_v57 }
  0xe8   : > { %749 = vrsqrt.f32 %v469_v58  ;;  %vm476_vm3 = vweird.f32 %v469_v58 }
  0xee   : > { %v750_v59 = vpop.eup %749 }
  0xef   : > { %v471_v60 = vmul.f32 %v750_v59, %v469_v58  ;;  %vm477_vm2 = vweird.f32 %v750_v59 }
  0xf0   : > { %vm478_vm4 = vmor %vm476_vm3, %vm477_vm2 }
  0xf1   : > { %v472_v61 = vmul.f32 %v750_v59, %v471_v60 }
  0xf3   : > { %v473_v62 = vmul.f32 0.5, %v472_v61 }
  0xf5   : > { %v474_v63 = vsub.f32 1.5, %v473_v62 }
  0xf7   : > { %v475_v1 = vmul.f32 %v750_v59, %v474_v63 }
  0xf9   : > { %v479_v2 = vsel %vm478_vm4, %v750_v59, %v475_v1 }
  0xfa   : > { %v480_v3 = vmul.f32 %v479_v2, %v468_v0 }
  0xfc   : > { %v485_v5 = vperm.slane %v480_v3, 0  ;;  %v482_v6 = vmul.f32 %v480_v3, %v454_v48 }
  0xfe   : > { %v483_v7 = vsub.f32 %v481_v4, %v482_v6  ;;  %v488_v8 = vmul.f32 %v485_v5, %v939_v25  ;;  %v487_v9 = vmul.f32 %v485_v5, %v933_v20 }
 0x100   : > { %v490_v10 = vperm.slane %v483_v7, 0 }
 0x102   : > { %v492_v11 = vadd.f32 %v490_v10, %v487_v9  ;;  %v493_v12 = vadd.f32 %v490_v10, %v488_v8 }
 0x104   : > { %v494_v13 = vmax.f32 %v492_v11, 0.0  ;;  %v495_v14 = vmax.f32 %v493_v12, 0.0 }
 0x106   : > { %530 = vmatmul.f32.vlgmr.msra.gmra.mxu1 %v494_v13  ;;  %533 = vmatmul.f32.vlgmr.msra.gmra.mxu2 %v495_v14 }
 0x183   : > { %v531_v16 = vpop.f32.mrf.mxu1 }
 0x184   : > { %v537_v17 = vadd.f32 %v531_v16, %v496_v15 }
 0x186   : > { %540 = vst.msk [vmem:[%s921_s1] sm:$0xff] %vm539_vm5, %v537_v17 }
 0x189   : > { %v534_v19 = vpop.f32.mrf.mxu2 }
 0x18a   : > { %v538_v21 = vadd.f32 %v534_v19, %v497_v18 }
 0x18c   : > { %541 = vst.msk [vmem:[%s921_s1 + $0x8] sm:$0xff] %vm539_vm5, %v538_v21 }
 0x18d PF: > { %s15_s24 = sadd.s32 1, %s805_s24   ;;  %s1003_s18 = smov %s785_s19 }
 0x18e   : > { %p12_p0 = scmp.ge.s32.totalorder %s15_s24, 6   ;;  %s1004_s19 = smov %s889_s8 }
 0x18f   : > { %s1005_s20 = smov %s797_s22  ;;  %s1006_s21 = smov %s801_s23 }
 0x190   : > { %s1007_s22 = smov %s1010_s25  ;;  %s1008_s23 = smov %s1014_s26 }
 0x191   :  { %14 = sbr.rel (!%p12_p0) target bundleno = 6 (0x6), region = 126 }

</bundles_post_ra>
